<compile_context>
chip_gen: v6e
topology: v6e:2x2x1
jax: 0.10.0
libtpu: 0.0.40
codegen_flags: <defaults>
</compile_context>

<pallas_src>
import functools

import jax
import jax.numpy as jnp
from jax import lax
from jax.experimental import pallas as pl
from jax.experimental.pallas import tpu as pltpu

_EPS = 1e-8  # nn.CosineSimilarity default eps


def _cosine_dist_kernel(x1_ref, x2_ref, out_ref, s11_ref, s12_ref, s22_ref):
    """Grid = (B_tiles, D_tiles); D (reduction) axis is last / 'arbitrary'."""
    k = pl.program_id(1)

    @pl.when(k == 0)
    def _init():
        s11_ref[...] = jnp.zeros_like(s11_ref)
        s12_ref[...] = jnp.zeros_like(s12_ref)
        s22_ref[...] = jnp.zeros_like(s22_ref)

    # Cast only the current (B_blk, D_blk) tile to f32 (v5e VPU has no bf16 math;
    # per-tile widening keeps the live VMEM working set small on v7x's 64 MiB).
    x1 = x1_ref[...].astype(jnp.float32)
    x2 = x2_ref[...].astype(jnp.float32)

    # Three independent row reductions — no concat: the lane reduce is per-vreg,
    # stacking to (3B, D) saves zero XLU ops and costs extra copies.
    s11_ref[...] += jnp.sum(x1 * x1, axis=-1, keepdims=True)
    s12_ref[...] += jnp.sum(x1 * x2, axis=-1, keepdims=True)
    s22_ref[...] += jnp.sum(x2 * x2, axis=-1, keepdims=True)

    @pl.when(k == pl.num_programs(1) - 1)
    def _finalize():
        eps2 = jnp.float32(_EPS * _EPS)
        # cos = s12 / (max(||x1||,eps) * max(||x2||,eps)); per-norm rsqrt runs on
        # the EUP slot and avoids f32 overflow of the product s11*s22.
        inv1 = lax.rsqrt(jnp.maximum(s11_ref[...], eps2))
        inv2 = lax.rsqrt(jnp.maximum(s22_ref[...], eps2))
        cos = s12_ref[...] * inv1 * inv2
        out_ref[...] = (jnp.float32(1.0) - cos).astype(out_ref.dtype)


def _pick_block(dim, candidates):
    """Largest candidate that evenly divides `dim`, else the full dim."""
    for c in candidates:
        if c <= dim and dim % c == 0:
            return c
    return dim


def similarity_metric_forward(x1, x2):
    """Mirrors similarity_metric.forward(x1, x2): returns 1 - cos(x1, x2), shape (B,)."""
    assert x1.shape == x2.shape and x1.ndim == 2, "expected (B, D) inputs"
    B, D = x1.shape

    # Budget: 2 inputs x 2 pipeline buffers x B_blk x D_blk x 4 B (f32 worst case)
    # = at most ~8 MiB, comfortably inside v7x's 32 MiB scoped / 64 MiB physical.
    b_blk = _pick_block(B, (256, 128, 64, 32, 16, 8))
    d_blk = _pick_block(D, (2048, 1024, 512, 256, 128))
    grid = (B // b_blk, D // d_blk)

    bytes_in = x1.size * x1.dtype.itemsize + x2.size * x2.dtype.itemsize
    cost = pl.CostEstimate(
        flops=6 * B * D + 8 * B,   # 3 muls + 3 adds per element + tiny epilogue
        transcendentals=2 * B,     # per-row rsqrt x2
        bytes_accessed=bytes_in + B * 4,
    )

    out = pl.pallas_call(
        _cosine_dist_kernel,
        out_shape=jax.ShapeDtypeStruct((B, 1), jnp.float32),
        grid_spec=pltpu.PrefetchScalarGridSpec(
            num_scalar_prefetch=0,
            grid=grid,
            in_specs=[
                pl.BlockSpec((b_blk, d_blk), lambda i, k: (i, k)),  # x1 tile
                pl.BlockSpec((b_blk, d_blk), lambda i, k: (i, k)),  # x2 tile
            ],
            out_specs=pl.BlockSpec((b_blk, 1), lambda i, k: (i, 0)),
            scratch_shapes=[
                pltpu.VMEM((b_blk, 1), jnp.float32),  # s11 accumulator
                pltpu.VMEM((b_blk, 1), jnp.float32),  # s12 accumulator
                pltpu.VMEM((b_blk, 1), jnp.float32),  # s22 accumulator
            ],
        ),
        compiler_params=pltpu.CompilerParams(
            # Batch axis shards across v7x's 2 TCs; reduction axis stays last.
            dimension_semantics=("parallel", "arbitrary"),
            # Raise v5e's 16 MiB scoped-VMEM default; safe on v6e/v7x too.
            vmem_limit_bytes=32 * 1024 * 1024,
        ),
        cost_estimate=cost,
    )(x1, x2)
    # TODO(synk): for very large B, emit a lane-dense (1, B) output (transpose in
    # the epilogue) instead of (B, 1) to avoid the masked vst writeback.
    return out.reshape(B)


def _reference(x1, x2):
    """Pure-JAX reference matching torch.nn.CosineSimilarity(dim=1)."""
    x1 = x1.astype(jnp.float32)
    x2 = x2.astype(jnp.float32)
    s12 = jnp.sum(x1 * x2, axis=1)
    n1 = jnp.maximum(jnp.sqrt(jnp.sum(x1 * x1, axis=1)), _EPS)
    n2 = jnp.maximum(jnp.sqrt(jnp.sum(x2 * x2, axis=1)), _EPS)
    return 1.0 - s12 / (n1 * n2)


if __name__ == "__main__":
    key = jax.random.PRNGKey(0)
    k1, k2, k3, k4 = jax.random.split(key, 4)

    # Small shape implied by the module: a batch of D-dim embeddings, cos over dim=1.
    B, D = 8, 32
    x1 = jax.random.normal(k1, (B, D), dtype=jnp.float32)
    x2 = jax.random.normal(k2, (B, D), dtype=jnp.float32)

    out = similarity_metric_forward(x1, x2)
    jax.block_until_ready(out)
    ref = _reference(x1, x2)
    assert out.shape == (B,), out.shape
    assert jnp.allclose(out, ref, rtol=1e-5, atol=1e-5), (out, ref)

    # bf16 inputs: cast happens per-tile inside the kernel, no wrapper-side cast.
    out_bf16 = similarity_metric_forward(
        x1.astype(jnp.bfloat16), x2.astype(jnp.bfloat16)
    )
    jax.block_until_ready(out_bf16)
    ref_bf16 = _reference(x1.astype(jnp.bfloat16), x2.astype(jnp.bfloat16))
    assert jnp.allclose(out_bf16, ref_bf16, rtol=5e-2, atol=5e-2)

    # Moderately larger shape exercising the pipelined grid + D-axis accumulators.
    Bl, Dl = 16, 4096
    y1 = jax.random.normal(k3, (Bl, Dl), dtype=jnp.float32)
    y2 = jax.random.normal(k4, (Bl, Dl), dtype=jnp.float32)
    out_l = similarity_metric_forward(y1, y2)
    jax.block_until_ready(out_l)
    assert jnp.allclose(out_l, _reference(y1, y2), rtol=1e-5, atol=1e-5)

    print("KERNEL_OK")
</pallas_src>

<mosaic_0001>
module attributes {stable_mosaic.version = 11 : i64} {
  func.func @_cosine_dist_kernel(%arg0: i32, %arg1: i32, %arg2: memref<8x32xf32, #tpu.memory_space<vmem>>, %arg3: memref<8x32xf32, #tpu.memory_space<vmem>>, %arg4: memref<8x1xf32, #tpu.memory_space<vmem>>, %arg5: memref<8x1xf32, #tpu.memory_space<vmem>>, %arg6: memref<8x1xf32, #tpu.memory_space<vmem>>, %arg7: memref<8x1xf32, #tpu.memory_space<vmem>>) attributes {dimension_semantics = [#tpu.dimension_semantics<parallel>, #tpu.dimension_semantics<arbitrary>], iteration_bounds = array<i64: 1, 1>, scalar_prefetch = 0 : i64, scratch_operands = 3 : i64, tpu.core_type = #tpu.core_type<tc>, window_params = [{transform_indices = @transform_0, window_bounds = array<i64: 8, 32>}, {transform_indices = @transform_1, window_bounds = array<i64: 8, 32>}, {transform_indices = @transform_2, window_bounds = array<i64: 8, 1>}]} {
    %c0_i32 = arith.constant 0 : i32
    %0 = arith.cmpi eq, %arg1, %c0_i32 : i32
    %1 = arith.extui %0 : i1 to i32
    %c0_i32_0 = arith.constant 0 : i32
    %2 = arith.cmpi ne, %1, %c0_i32_0 : i32
    scf.if %2 {
      %cst_20 = arith.constant 0.000000e+00 : f32
      %26 = vector.broadcast %cst_20 : f32 to vector<8x1xf32>
      %c0_21 = arith.constant 0 : index
      %c0_22 = arith.constant 0 : index
      %27 = vector.load %arg5[%c0_21, %c0_22] : memref<8x1xf32, #tpu.memory_space<vmem>>, vector<8x1xf32>
      tpu.vector_store %arg5[%c0_21, %c0_22], %26 {strides = array<i32>} : memref<8x1xf32, #tpu.memory_space<vmem>>, vector<8x1xf32>,
      %cst_23 = arith.constant 0.000000e+00 : f32
      %28 = vector.broadcast %cst_23 : f32 to vector<8x1xf32>
      %c0_24 = arith.constant 0 : index
      %c0_25 = arith.constant 0 : index
      %29 = vector.load %arg6[%c0_24, %c0_25] : memref<8x1xf32, #tpu.memory_space<vmem>>, vector<8x1xf32>
      tpu.vector_store %arg6[%c0_24, %c0_25], %28 {strides = array<i32>} : memref<8x1xf32, #tpu.memory_space<vmem>>, vector<8x1xf32>,
      %cst_26 = arith.constant 0.000000e+00 : f32
      %30 = vector.broadcast %cst_26 : f32 to vector<8x1xf32>
      %c0_27 = arith.constant 0 : index
      %c0_28 = arith.constant 0 : index
      %31 = vector.load %arg7[%c0_27, %c0_28] : memref<8x1xf32, #tpu.memory_space<vmem>>, vector<8x1xf32>
      tpu.vector_store %arg7[%c0_27, %c0_28], %30 {strides = array<i32>} : memref<8x1xf32, #tpu.memory_space<vmem>>, vector<8x1xf32>,
    } else {
    }
    %c0 = arith.constant 0 : index
    %c0_1 = arith.constant 0 : index
    %3 = vector.load %arg2[%c0, %c0_1] : memref<8x32xf32, #tpu.memory_space<vmem>>, vector<8x32xf32>
    %c0_2 = arith.constant 0 : index
    %c0_3 = arith.constant 0 : index
    %4 = vector.load %arg3[%c0_2, %c0_3] : memref<8x32xf32, #tpu.memory_space<vmem>>, vector<8x32xf32>
    %c0_4 = arith.constant 0 : index
    %c0_5 = arith.constant 0 : index
    %5 = vector.load %arg5[%c0_4, %c0_5] : memref<8x1xf32, #tpu.memory_space<vmem>>, vector<8x1xf32>
    %6 = arith.mulf %3, %3 : vector<8x32xf32>
    %cst = arith.constant dense<0.000000e+00> : vector<8xf32>
    %7 = vector.multi_reduction <add>, %6, %cst [1] : vector<8x32xf32> to vector<8xf32>
    %8 = vector.shape_cast %7 : vector<8xf32> to vector<8x1xf32>
    %9 = arith.addf %5, %8 : vector<8x1xf32>
    %c0_6 = arith.constant 0 : index
    %c0_7 = arith.constant 0 : index
    %10 = vector.load %arg5[%c0_6, %c0_7] : memref<8x1xf32, #tpu.memory_space<vmem>>, vector<8x1xf32>
    tpu.vector_store %arg5[%c0_6, %c0_7], %9 {strides = array<i32>} : memref<8x1xf32, #tpu.memory_space<vmem>>, vector<8x1xf32>,
    %c0_8 = arith.constant 0 : index
    %c0_9 = arith.constant 0 : index
    %11 = vector.load %arg6[%c0_8, %c0_9] : memref<8x1xf32, #tpu.memory_space<vmem>>, vector<8x1xf32>
    %12 = arith.mulf %3, %4 : vector<8x32xf32>
    %cst_10 = arith.constant dense<0.000000e+00> : vector<8xf32>
    %13 = vector.multi_reduction <add>, %12, %cst_10 [1] : vector<8x32xf32> to vector<8xf32>
    %14 = vector.shape_cast %13 : vector<8xf32> to vector<8x1xf32>
    %15 = arith.addf %11, %14 : vector<8x1xf32>
    %c0_11 = arith.constant 0 : index
    %c0_12 = arith.constant 0 : index
    %16 = vector.load %arg6[%c0_11, %c0_12] : memref<8x1xf32, #tpu.memory_space<vmem>>, vector<8x1xf32>
    tpu.vector_store %arg6[%c0_11, %c0_12], %15 {strides = array<i32>} : memref<8x1xf32, #tpu.memory_space<vmem>>, vector<8x1xf32>,
    %c0_13 = arith.constant 0 : index
    %c0_14 = arith.constant 0 : index
    %17 = vector.load %arg7[%c0_13, %c0_14] : memref<8x1xf32, #tpu.memory_space<vmem>>, vector<8x1xf32>
    %18 = arith.mulf %4, %4 : vector<8x32xf32>
    %cst_15 = arith.constant dense<0.000000e+00> : vector<8xf32>
    %19 = vector.multi_reduction <add>, %18, %cst_15 [1] : vector<8x32xf32> to vector<8xf32>
    %20 = vector.shape_cast %19 : vector<8xf32> to vector<8x1xf32>
    %21 = arith.addf %17, %20 : vector<8x1xf32>
    %c0_16 = arith.constant 0 : index
    %c0_17 = arith.constant 0 : index
    %22 = vector.load %arg7[%c0_16, %c0_17] : memref<8x1xf32, #tpu.memory_space<vmem>>, vector<8x1xf32>
    tpu.vector_store %arg7[%c0_16, %c0_17], %21 {strides = array<i32>} : memref<8x1xf32, #tpu.memory_space<vmem>>, vector<8x1xf32>,
    %c0_i32_18 = arith.constant 0 : i32
    %23 = arith.cmpi eq, %arg1, %c0_i32_18 : i32
    %24 = arith.extui %23 : i1 to i32
    %c0_i32_19 = arith.constant 0 : i32
    %25 = arith.cmpi ne, %24, %c0_i32_19 : i32
    scf.if %25 {
      %c0_20 = arith.constant 0 : index
      %c0_21 = arith.constant 0 : index
      %26 = vector.load %arg5[%c0_20, %c0_21] : memref<8x1xf32, #tpu.memory_space<vmem>>, vector<8x1xf32>
      %cst_22 = arith.constant 1.000000e-16 : f32
      %27 = vector.broadcast %cst_22 : f32 to vector<8x1xf32>
      %28 = arith.maximumf %26, %27 : vector<8x1xf32>
      %29 = math.rsqrt %28 : vector<8x1xf32>
      %c0_23 = arith.constant 0 : index
      %c0_24 = arith.constant 0 : index
      %30 = vector.load %arg7[%c0_23, %c0_24] : memref<8x1xf32, #tpu.memory_space<vmem>>, vector<8x1xf32>
      %cst_25 = arith.constant 1.000000e-16 : f32
      %31 = vector.broadcast %cst_25 : f32 to vector<8x1xf32>
      %32 = arith.maximumf %30, %31 : vector<8x1xf32>
      %33 = math.rsqrt %32 : vector<8x1xf32>
      %c0_26 = arith.constant 0 : index
      %c0_27 = arith.constant 0 : index
      %34 = vector.load %arg6[%c0_26, %c0_27] : memref<8x1xf32, #tpu.memory_space<vmem>>, vector<8x1xf32>
      %35 = arith.mulf %34, %29 : vector<8x1xf32>
      %36 = arith.mulf %35, %33 : vector<8x1xf32>
      %cst_28 = arith.constant 1.000000e+00 : f32
      %37 = vector.broadcast %cst_28 : f32 to vector<8x1xf32>
      %38 = arith.subf %37, %36 : vector<8x1xf32>
      %c0_29 = arith.constant 0 : index
      %c0_30 = arith.constant 0 : index
      %39 = vector.load %arg4[%c0_29, %c0_30] : memref<8x1xf32, #tpu.memory_space<vmem>>, vector<8x1xf32>
      tpu.vector_store %arg4[%c0_29, %c0_30], %38 {strides = array<i32>} : memref<8x1xf32, #tpu.memory_space<vmem>>, vector<8x1xf32>,
    } else {
    }
    return
  }
  func.func @transform_0(%arg0: i32, %arg1: i32) -> (i32, i32) {
    %c0_i32 = arith.constant 0 : i32
    return %arg0, %arg1 : i32, i32
  }
  func.func @transform_1(%arg0: i32, %arg1: i32) -> (i32, i32) {
    %c0_i32 = arith.constant 0 : i32
    return %arg0, %arg1 : i32, i32
  }
  func.func @transform_2(%arg0: i32, %arg1: i32) -> (i32, i32) {
    %c0_i32 = arith.constant 0 : i32
    %c0_i32_0 = arith.constant 0 : i32
    return %arg0, %c0_i32 : i32, i32
  }
}

</mosaic_0001>

<bundles_post_ra>
// kernel: tpu_custom_call.1
= control target key start
LH: loop header
LB: loop body
LE: loop exit
PB: predicated region body
PF: predicated region fallthrough
CT: control target
= control target key end

     0   :  { %7 = vsyncpa [#allocation6], 0  ;;  %s173_s0 = inlined_call_operand.hbm [shape: f32[8,32], index: 0, kind: input, shape index: {}]   ;;  %s174_s1 = inlined_call_operand.hbm [shape: f32[8,32], index: 1, kind: input, shape index: {}]   ;;  %s175_s2 = inlined_call_operand.vmem [shape: f32[8,1], index: 2, kind: output, shape index: {}]  }
   0x1   :  { %8 = vsyncpa [#allocation8], 0  ;;  %s139_s9 = smov [#allocation5]   ;;  %s140_s11 = smov [#allocation7]  }
   0x2   :  { %s15_s10 = sshll.u32 %s139_s9, 4  ;;  %s25_s12 = sshll.u32 %s140_s11, 4  ;;  %s16_s10 = int_to_ptr.vmem [resolvable:$true] %s15_s10  ;;  %s26_s12 = int_to_ptr.vmem [resolvable:$true] %s25_s12 }
   0x3   :  { %s103_s13 = scalar_lea.vmem %s16_s10, 128  ;;  %p108_p1 = scmp.lt.s32.totalorder %s16_s10, %s16_s10 }
   0x4   :  { %p104_p0 = scmp.ne.s32.totalorder %s16_s10, %s103_s13  ;;  %p109_p2 = scmp.lt.s32.totalorder %s103_s13, %s103_s13 }
   0x6   :  { %p110_p3 = por %p109_p2, %p108_p1 }
   0x8   :  { %p111_p4 = pnand %p110_p3, %p104_p0 }
   0xa   :  { %114 = shalt.err (!%p111_p4)
}
   0xb   :  { %18 = dma.hbm_to_vmem [thread:$0]  %s173_s0, 128, %s16_s10, [#allocation6]  }
   0xc   :  { %s123_s16 = scalar_lea.vmem %s26_s12, 128  ;;  %p128_p6 = scmp.lt.s32.totalorder %s26_s12, %s26_s12 }
   0xd   :  { %p124_p5 = scmp.ne.s32.totalorder %s26_s12, %s123_s16  ;;  %p129_p7 = scmp.lt.s32.totalorder %s123_s16, %s123_s16 }
   0xf   :  { %p130_p8 = por %p129_p7, %p128_p6 }
  0x11   :  { %p131_p9 = pnand %p130_p8, %p124_p5 }
  0x13   :  { %134 = shalt.err (!%p131_p9)
}
  0x14   :  { %28 = dma.hbm_to_vmem [thread:$0]  %s174_s1, 128, %s26_s12, [#allocation8]  }
  0x15   :  { %135 = dma.done.wait [#allocation6], 128  }
  0x16   :  { %136 = vsyncadd [#allocation6], 4294967168 }
  0x17   :  { %137 = dma.done.wait [#allocation8], 128  }
  0x18   :  { %138 = vsyncadd [#allocation8], 4294967168  ;;  %vm39_vm0 = vcmask 7168   ;;  %v141_v0 = vmov 0.0   ;;  %v43_v1 = vld [vmem:[#allocation5] sm:$0xff]  ;;  %vm47_vm1 = vcmask 261120  }
  0x19   :  { %40 = vst.msk [vmem:[#allocation2] sm:$0xff] %vm39_vm0, %v141_v0  ;;  %41 = vst.msk [vmem:[#allocation3] sm:$0xff] %vm39_vm0, %v141_v0  ;;  %v44_v2 = vld [vmem:[#allocation7] sm:$0xff]  ;;  %v46_v3 = vmul.f32 %v43_v1, %v43_v1 }
  0x1a   :  { %42 = vst.msk [vmem:[#allocation4] sm:$0xff] %vm39_vm0, %v141_v0  ;;  %v62_v4 = vmul.f32 %v44_v2, %v44_v2  ;;  %v55_v5 = vmul.f32 %v44_v2, %v43_v1 }
  0x1b   :  { %v48_v6 = vsel %vm47_vm1, %v46_v3, 0.0 }
  0x1c   :  { %v56_v7 = vsel %vm47_vm1, %v55_v5, 0.0  ;;  %49 = vadd.xlane.f32.xlu0 %v48_v6  ;;  %v63_v8 = vsel %vm47_vm1, %v62_v4, 0.0 }
  0x1d   :  { %57 = vadd.xlane.f32.xlu1 %v56_v7 }
  0x20   :  { %64 = vadd.xlane.f32.xlu0 %v63_v8  ;;  %v45_v9 = vld [vmem:[#allocation2] sm:$0xff]  ;;  %v54_v10 = vld [vmem:[#allocation3] sm:$0xff] }
  0x21   :  { %v61_v15 = vld [vmem:[#allocation4] sm:$0xff] }
  0xa5   :  { %v50_v11 = vpop.xlane.xlu0 %49 }
  0xa6   :  { %v58_v12 = vpop.xlane.xlu1 %57  ;;  %v51_v13 = vadd.f32 %v50_v11, %v45_v9 }
  0xa7   :  { %v59_v14 = vadd.f32 %v58_v12, %v54_v10 }
  0xa8   :  { %53 = vst.msk [vmem:[#allocation2] sm:$0xff] %vm39_vm0, %v51_v13 }
  0xa9   :  { %60 = vst.msk [vmem:[#allocation3] sm:$0xff] %vm39_vm0, %v59_v14  ;;  %v65_v16 = vpop.xlane.xlu0 %64 }
  0xaa   :  { %v66_v17 = vadd.f32 %v65_v16, %v61_v15 }
  0xac   :  { %67 = vst.msk [vmem:[#allocation4] sm:$0xff] %vm39_vm0, %v66_v17 }
  0xaf   :  { %v71_v18 = vld [vmem:[#allocation2] sm:$0xff] }
  0xb0   :  { %v72_v19 = vmax.f32 %v71_v18, 1e-16  ;;  %v77_v23 = vld [vmem:[#allocation3] sm:$0xff] }
  0xb2   :  { %91 = vrsqrt.f32 %v72_v19 }
  0xb3   :  { %v74_v20 = vld [vmem:[#allocation4] sm:$0xff] }
  0xb4   :  { %v75_v21 = vmax.f32 %v74_v20, 1e-16 }
  0xb6   :  { %93 = vrsqrt.f32 %v75_v21 }
  0xbf   :  { %v92_v22 = vpop.eup %91 }
  0xc0   :  { %v78_v24 = vmul.f32 %v92_v22, %v77_v23 }
  0xc3   :  { %v94_v25 = vpop.eup %93 }
  0xc4   :  { %v79_v26 = vmul.f32 %v94_v25, %v78_v24 }
  0xc6   :  { %v80_v27 = vsub.f32 1.0, %v79_v26 }
  0xc8   :  { %81 = vst.msk [vmem:[%s175_s2] sm:$0xff] %vm39_vm0, %v80_v27 }
  0xc9   :  { %86 = vsyncpa [#allocation6], 1 }
  0xca   :  { %87 = vsyncpa [#allocation8], 1 }

</bundles_post_ra>
